<compile_context>
chip_gen: v7x
topology: tpu7x:2x2x1
jax: 0.10.0
libtpu: 0.0.40
codegen_flags: <defaults>
</compile_context>

<pallas_src>
import jax
import jax.numpy as jnp
from jax.experimental import pallas as pl
from jax.experimental.pallas import tpu as pltpu

HIDDEN = 768           # 6 * 128 lanes
MID = 300
MID_PAD = 384          # 3 * 128 lanes
N_CLS = 6
N_REG = 1
N_OUT_PAD = 128        # fused (fc | fc2) output padded to one full lane group
TM_CAP = 1024          # default row-tile cap (fits v5e's 16 MiB default scoped VMEM)


def _head_kernel(h_ref, w3_ref, b3_ref, w23_ref, b23_ref, o_ref):
    # dropout (eval -> identity); relu on f32 hidden states, then cast to bf16
    # in-kernel right before the MXU (no wrapper-side cast pass over HBM).
    h = jnp.maximum(h_ref[...], 0.0).astype(jnp.bfloat16)

    # fc3: [tm, 768]bf16 @ [768, 384]bf16 -> f32 acc, + b3, relu
    x = jnp.dot(h, w3_ref[...], preferred_element_type=jnp.float32) + b3_ref[...]
    x = jnp.maximum(x, 0.0)

    # fused fc|fc2: [tm, 384]bf16 @ [384, 128]bf16 -> f32 acc, + packed bias
    out = jnp.dot(x.astype(jnp.bfloat16), w23_ref[...],
                  preferred_element_type=jnp.float32) + b23_ref[...]
    o_ref[...] = out.astype(o_ref.dtype)


def _prep_head_params(w3, b3, w, b, w2, b2):
    """Pad MID 300->384, fuse fc/fc2 into one [384, 128] weight, cast to bf16."""
    w3p = jnp.zeros((HIDDEN, MID_PAD), jnp.bfloat16)
    w3p = w3p.at[:, :MID].set(w3.astype(jnp.bfloat16))
    b3p = jnp.zeros((1, MID_PAD), jnp.float32).at[:, :MID].set(b3)

    w23 = jnp.zeros((MID_PAD, N_OUT_PAD), jnp.bfloat16)
    w23 = w23.at[:MID, :N_CLS].set(w.astype(jnp.bfloat16))
    w23 = w23.at[:MID, N_CLS:N_CLS + N_REG].set(w2.astype(jnp.bfloat16))

    b23 = jnp.zeros((1, N_OUT_PAD), jnp.float32)
    b23 = b23.at[:, :N_CLS].set(b)
    b23 = b23.at[:, N_CLS:N_CLS + N_REG].set(b2)
    return w3p, b3p, w23, b23


def _pick_tm(M, cap=TM_CAP):
    """Row tile: multiple of 16 (bf16 sublane packing), capped so VMEM stays
    well inside every generation's default scoped limit."""
    m16 = ((max(M, 1) + 15) // 16) * 16
    return min(cap, m16)


def multi_model_head(hidden, w3, b3, w, b, w2, b2, *, tm=None):
    """hidden: [M, 768] f32; weights pre-transposed to (in, out).

    Returns ([M, 6], [M, 1]) f32."""
    M, H = hidden.shape
    assert H == HIDDEN
    if tm is None:
        tm = _pick_tm(M)

    w3p, b3p, w23, b23 = _prep_head_params(w3, b3, w, b, w2, b2)

    grid = (pl.cdiv(M, tm),)      # ragged last block handled by Pallas write-masking
    full = lambda i: (0, 0)
    rows = lambda i: (i, 0)

    cost = pl.CostEstimate(
        flops=2 * M * HIDDEN * MID_PAD + 2 * M * MID_PAD * N_OUT_PAD,
        transcendentals=0,
        bytes_accessed=(M * HIDDEN * 4            # hidden read (f32)
                        + M * N_OUT_PAD * 4       # packed output write (f32)
                        + HIDDEN * MID_PAD * 2    # fc3 weight (bf16)
                        + MID_PAD * N_OUT_PAD * 2 # fused fc|fc2 weight (bf16)
                        + (MID_PAD + N_OUT_PAD) * 4))

    out = pl.pallas_call(
        _head_kernel,
        out_shape=jax.ShapeDtypeStruct((M, N_OUT_PAD), jnp.float32),
        grid_spec=pltpu.PrefetchScalarGridSpec(
            num_scalar_prefetch=0,
            grid=grid,
            in_specs=[
                pl.BlockSpec((tm, HIDDEN), rows),          # hidden rows (f32)
                pl.BlockSpec((HIDDEN, MID_PAD), full),     # fc3 weight^T (padded, bf16)
                pl.BlockSpec((1, MID_PAD), full),          # fc3 bias (padded, f32)
                pl.BlockSpec((MID_PAD, N_OUT_PAD), full),  # fused fc|fc2 weight^T (bf16)
                pl.BlockSpec((1, N_OUT_PAD), full),        # fused fc|fc2 bias (f32)
            ],
            out_specs=pl.BlockSpec((tm, N_OUT_PAD), rows),
        ),
        compiler_params=pltpu.CompilerParams(
            dimension_semantics=("parallel",)),
        cost_estimate=cost,
    )(hidden.astype(jnp.float32), w3p, b3p, w23, b23)

    o1 = out[:, :N_CLS]
    o2 = out[:, N_CLS:N_CLS + N_REG]
    return o1, o2


def multi_model_forward(ids, mask, params):
    """Full forward: synthetic backbone (glue) + Pallas head.

    ids, mask: [B, S] int32. Returns ([B, S, 6], [B, S, 1])."""
    B, S = ids.shape
    # --- synthetic backbone (stand-in for AutoModel last_hidden_state) ---
    emb = params["emb"]                                        # [vocab, 768]
    hidden = emb[ids] * mask[..., None].astype(jnp.float32)    # [B, S, 768]
    hidden2d = hidden.reshape(B * S, HIDDEN)

    o1, o2 = multi_model_head(
        hidden2d,
        params["w3_t"], params["b3"],
        params["w_t"], params["b"],
        params["w2_t"], params["b2"],
    )
    return o1.reshape(B, S, N_CLS), o2.reshape(B, S, N_REG)


def init_params(key, vocab=100):
    ks = jax.random.split(key, 7)
    scale = 0.02
    return {
        "emb": scale * jax.random.normal(ks[0], (vocab, HIDDEN), jnp.float32),
        # Linear weights stored pre-transposed: (in_features, out_features)
        "w3_t": scale * jax.random.normal(ks[1], (HIDDEN, MID), jnp.float32),
        "b3": scale * jax.random.normal(ks[2], (1, MID), jnp.float32),
        "w_t": scale * jax.random.normal(ks[3], (MID, N_CLS), jnp.float32),
        "b": scale * jax.random.normal(ks[4], (1, N_CLS), jnp.float32),
        "w2_t": scale * jax.random.normal(ks[5], (MID, N_REG), jnp.float32),
        "b2": scale * jax.random.normal(ks[6], (1, N_REG), jnp.float32),
    }


if __name__ == "__main__":
    key = jax.random.PRNGKey(0)
    k_ids, k_params = jax.random.split(key)

    B, S = 2, 8
    ids = jax.random.randint(k_ids, (B, S), 0, 100, dtype=jnp.int32)
    mask = jnp.ones((B, S), dtype=jnp.int32)

    params = init_params(k_params)

    out_cls, out_reg = multi_model_forward(ids, mask, params)
    jax.block_until_ready((out_cls, out_reg))

    # --- reference 1: exact emulation of the kernel's relu->bf16 / f32-acc math ---
    hidden = params["emb"][ids] * mask[..., None].astype(jnp.float32)
    h2d = hidden.reshape(B * S, HIDDEN)
    hb = jnp.maximum(h2d, 0.0).astype(jnp.bfloat16).astype(jnp.float32)
    w3b = params["w3_t"].astype(jnp.bfloat16).astype(jnp.float32)
    wb = params["w_t"].astype(jnp.bfloat16).astype(jnp.float32)
    w2b = params["w2_t"].astype(jnp.bfloat16).astype(jnp.float32)

    x = jnp.maximum(hb @ w3b + params["b3"][0], 0.0)
    xb = x.astype(jnp.bfloat16).astype(jnp.float32)
    ref_cls_q = (xb @ wb + params["b"][0]).reshape(B, S, N_CLS)
    ref_reg_q = (xb @ w2b + params["b2"][0]).reshape(B, S, N_REG)
    assert jnp.allclose(out_cls, ref_cls_q, atol=1e-4)
    assert jnp.allclose(out_reg, ref_reg_q, atol=1e-4)

    # --- reference 2: full-f32 module semantics (loose tol covers bf16 rounding) ---
    xf = jnp.maximum(jnp.maximum(h2d, 0.0) @ params["w3_t"] + params["b3"][0], 0.0)
    ref_cls_f = (xf @ params["w_t"] + params["b"][0]).reshape(B, S, N_CLS)
    ref_reg_f = (xf @ params["w2_t"] + params["b2"][0]).reshape(B, S, N_REG)
    assert jnp.allclose(out_cls, ref_cls_f, atol=3e-3)
    assert jnp.allclose(out_reg, ref_reg_f, atol=3e-3)

    # --- ragged-tail check: M not a multiple of tm exercises Pallas write masking ---
    M_rag = 20
    h_rag = 0.02 * jax.random.normal(jax.random.PRNGKey(1), (M_rag, HIDDEN),
                                     jnp.float32)
    o1r, o2r = multi_model_head(
        h_rag, params["w3_t"], params["b3"], params["w_t"], params["b"],
        params["w2_t"], params["b2"], tm=16)
    jax.block_until_ready((o1r, o2r))
    xr = jnp.maximum(jnp.maximum(h_rag, 0.0) @ params["w3_t"] + params["b3"][0], 0.0)
    assert jnp.allclose(o1r, xr @ params["w_t"] + params["b"][0], atol=3e-3)
    assert jnp.allclose(o2r, xr @ params["w2_t"] + params["b2"][0], atol=3e-3)
    assert o1r.shape == (M_rag, N_CLS) and o2r.shape == (M_rag, N_REG)

    assert out_cls.shape == (B, S, N_CLS) and out_reg.shape == (B, S, N_REG)
    print("KERNEL_OK")
</pallas_src>

<mosaic_0001>
module attributes {stable_mosaic.version = 11 : i64} {
  func.func @_head_kernel(%arg0: i32, %arg1: memref<16x768xf32, #tpu.memory_space<vmem>>, %arg2: memref<768x384xbf16, #tpu.memory_space<vmem>>, %arg3: memref<1x384xf32, #tpu.memory_space<vmem>>, %arg4: memref<384x128xbf16, #tpu.memory_space<vmem>>, %arg5: memref<1x128xf32, #tpu.memory_space<vmem>>, %arg6: memref<16x128xf32, #tpu.memory_space<vmem>>) attributes {dimension_semantics = [#tpu.dimension_semantics<parallel>], iteration_bounds = array<i64: 1>, scalar_prefetch = 0 : i64, scratch_operands = 0 : i64, tpu.core_type = #tpu.core_type<tc>, window_params = [{transform_indices = @transform_0, window_bounds = array<i64: 16, 768>}, {pipeline_mode = #tpu.pipeline_mode<synchronous>, transform_indices = @transform_1, window_bounds = array<i64: 768, 384>}, {pipeline_mode = #tpu.pipeline_mode<synchronous>, transform_indices = @transform_2, window_bounds = array<i64: 1, 384>}, {pipeline_mode = #tpu.pipeline_mode<synchronous>, transform_indices = @transform_3, window_bounds = array<i64: 384, 128>}, {pipeline_mode = #tpu.pipeline_mode<synchronous>, transform_indices = @transform_4, window_bounds = array<i64: 1, 128>}, {transform_indices = @transform_5, window_bounds = array<i64: 16, 128>}]} {
    %c0 = arith.constant 0 : index
    %c0_0 = arith.constant 0 : index
    %0 = vector.load %arg1[%c0, %c0_0] : memref<16x768xf32, #tpu.memory_space<vmem>>, vector<16x768xf32>
    %cst = arith.constant 0.000000e+00 : f32
    %1 = vector.broadcast %cst : f32 to vector<16x768xf32>
    %2 = arith.maximumf %0, %1 : vector<16x768xf32>
    %3 = arith.truncf %2 : vector<16x768xf32> to vector<16x768xbf16>
    %c0_1 = arith.constant 0 : index
    %c0_2 = arith.constant 0 : index
    %4 = vector.load %arg2[%c0_1, %c0_2] : memref<768x384xbf16, #tpu.memory_space<vmem>>, vector<768x384xbf16>
    %cst_3 = arith.constant dense<0.000000e+00> : vector<16x384xf32>
    %5 = tpu.matmul %3, %4, %cst_3 {dimension_numbers = #tpu.dot_dimension_numbers<[1], [0], [0], [1], [0, 0, 1, 1], [], []>} : vector<16x768xbf16>, vector<768x384xbf16>, vector<16x384xf32> -> vector<16x384xf32>
    %c0_4 = arith.constant 0 : index
    %c0_5 = arith.constant 0 : index
    %6 = vector.load %arg3[%c0_4, %c0_5] : memref<1x384xf32, #tpu.memory_space<vmem>>, vector<1x384xf32>
    %7 = vector.broadcast %6 : vector<1x384xf32> to vector<16x384xf32>
    %8 = arith.addf %5, %7 : vector<16x384xf32>
    %cst_6 = arith.constant 0.000000e+00 : f32
    %9 = vector.broadcast %cst_6 : f32 to vector<16x384xf32>
    %10 = arith.maximumf %8, %9 : vector<16x384xf32>
    %11 = arith.truncf %10 : vector<16x384xf32> to vector<16x384xbf16>
    %c0_7 = arith.constant 0 : index
    %c0_8 = arith.constant 0 : index
    %12 = vector.load %arg4[%c0_7, %c0_8] : memref<384x128xbf16, #tpu.memory_space<vmem>>, vector<384x128xbf16>
    %cst_9 = arith.constant dense<0.000000e+00> : vector<16x128xf32>
    %13 = tpu.matmul %11, %12, %cst_9 {dimension_numbers = #tpu.dot_dimension_numbers<[1], [0], [0], [1], [0, 0, 1, 1], [], []>} : vector<16x384xbf16>, vector<384x128xbf16>, vector<16x128xf32> -> vector<16x128xf32>
    %c0_10 = arith.constant 0 : index
    %c0_11 = arith.constant 0 : index
    %14 = vector.load %arg5[%c0_10, %c0_11] : memref<1x128xf32, #tpu.memory_space<vmem>>, vector<1x128xf32>
    %15 = vector.broadcast %14 : vector<1x128xf32> to vector<16x128xf32>
    %16 = arith.addf %13, %15 : vector<16x128xf32>
    %c0_12 = arith.constant 0 : index
    %c0_13 = arith.constant 0 : index
    %17 = vector.load %arg6[%c0_12, %c0_13] : memref<16x128xf32, #tpu.memory_space<vmem>>, vector<16x128xf32>
    tpu.vector_store %arg6[%c0_12, %c0_13], %16 {strides = array<i32>} : memref<16x128xf32, #tpu.memory_space<vmem>>, vector<16x128xf32>,
    return
  }
  func.func @transform_0(%arg0: i32) -> (i32, i32) {
    %c0_i32 = arith.constant 0 : i32
    %c0_i32_0 = arith.constant 0 : i32
    return %arg0, %c0_i32 : i32, i32
  }
  func.func @transform_1(%arg0: i32) -> (i32, i32) {
    %c0_i32 = arith.constant 0 : i32
    %c0_i32_0 = arith.constant 0 : i32
    %c0_i32_1 = arith.constant 0 : i32
    return %c0_i32, %c0_i32_0 : i32, i32
  }
  func.func @transform_2(%arg0: i32) -> (i32, i32) {
    %c0_i32 = arith.constant 0 : i32
    %c0_i32_0 = arith.constant 0 : i32
    %c0_i32_1 = arith.constant 0 : i32
    return %c0_i32, %c0_i32_0 : i32, i32
  }
  func.func @transform_3(%arg0: i32) -> (i32, i32) {
    %c0_i32 = arith.constant 0 : i32
    %c0_i32_0 = arith.constant 0 : i32
    %c0_i32_1 = arith.constant 0 : i32
    return %c0_i32, %c0_i32_0 : i32, i32
  }
  func.func @transform_4(%arg0: i32) -> (i32, i32) {
    %c0_i32 = arith.constant 0 : i32
    %c0_i32_0 = arith.constant 0 : i32
    %c0_i32_1 = arith.constant 0 : i32
    return %c0_i32, %c0_i32_0 : i32, i32
  }
  func.func @transform_5(%arg0: i32) -> (i32, i32) {
    %c0_i32 = arith.constant 0 : i32
    %c0_i32_0 = arith.constant 0 : i32
    return %arg0, %c0_i32 : i32, i32
  }
}

</mosaic_0001>

<bundles_post_ra>
// kernel: tpu_custom_call.1
= control target key start
LH: loop header
LB: loop body
LE: loop exit
PB: predicated region body
PF: predicated region fallthrough
CT: control target
= control target key end

     0   :  { %10 = vsyncpa [#allocation3], 0  ;;  %s2369_s0 = inlined_call_operand.hbm [shape: f32[16,768], index: 0, kind: input, shape index: {}]   ;;  %s2370_s1 = inlined_call_operand.hbm [shape: bf16[768,384], index: 1, kind: input, shape index: {}]   ;;  %s2371_s2 = inlined_call_operand.vmem [shape: f32[1,384], index: 2, kind: input, shape index: {}]   ;;  %s2372_s3 = inlined_call_operand.hbm [shape: bf16[384,128], index: 3, kind: input, shape index: {}]   ;;  %s2373_s4 = inlined_call_operand.vmem [shape: f32[1,128], index: 4, kind: input, shape index: {}]   ;;  %s2374_s5 = inlined_call_operand.hbm [shape: f32[16,128], index: 5, kind: output, shape index: {}]  }
   0x1   :  { %11 = vsyncpa [#allocation6], 0 }
   0x2   :  { %12 = vsyncpa [#allocation4], 0  ;;  %s2254_s18 = smov [#allocation5]   ;;  %s2160_s22 = scalar_lea.hbm %s2370_s1, 18432 }
   0x3   :  { %s30_s19 = sshll.u32 %s2254_s18, 4  ;;  %p2161_p0 = scmp.ne.s32.totalorder %s2370_s1, %s2160_s22  ;;  %s31_s19 = int_to_ptr.vmem [resolvable:$true] %s30_s19 }
   0x4   :  { %p2164_p1 = scmp.lt.u32.totalorder %s2160_s22, %s2370_s1 }
   0x6   :  { %p2166_p2 = pnand %p2164_p1, %p2161_p0 }
   0x8   :  { %2169 = shalt.err (!%p2166_p2)
}
   0x9   :  { %s2170_s27 = scalar_lea.vmem %s31_s19, 18432  ;;  %p2175_p4 = scmp.lt.s32.totalorder %s31_s19, %s31_s19 }
   0xa   :  { %p2171_p3 = scmp.ne.s32.totalorder %s31_s19, %s2170_s27  ;;  %p2176_p5 = scmp.lt.s32.totalorder %s2170_s27, %s2170_s27 }
   0xc   :  { %p2177_p6 = por %p2176_p5, %p2175_p4 }
   0xe   :  { %p2178_p7 = pnand %p2177_p6, %p2171_p3 }
  0x10   :  { %2181 = shalt.err (!%p2178_p7)
}
  0x11   :  { %s2255_s28 = smov 192   ;;  %s2256_s29 = smov 12  }
  0x12   :  { %36 = dma.hbm_to_vmem [thread:$0]  %s2370_s1, 18432, %s31_s19, [#allocation6], %s2255_s28, %s2255_s28, %s2256_s29  }
  0x13   :  { %s2257_s7 = smov [#allocation2]   ;;  %s2182_s11 = scalar_lea.hbm %s2369_s0, 1536 }
  0x14   :  { %s18_s8 = sshll.u32 %s2257_s7, 4  ;;  %p2183_p8 = scmp.ne.s32.totalorder %s2369_s0, %s2182_s11  ;;  %s19_s8 = int_to_ptr.vmem [resolvable:$true] %s18_s8 }
  0x15   :  { %p2186_p9 = scmp.lt.u32.totalorder %s2182_s11, %s2369_s0 }
  0x17   :  { %p2188_p10 = pnand %p2186_p9, %p2183_p8 }
  0x19   :  { %2191 = shalt.err (!%p2188_p10)
}
  0x1a   :  { %s2192_s16 = scalar_lea.vmem %s19_s8, 1536  ;;  %p2197_p12 = scmp.lt.s32.totalorder %s19_s8, %s19_s8 }
  0x1b   :  { %p2193_p11 = scmp.ne.s32.totalorder %s19_s8, %s2192_s16  ;;  %p2198_p13 = scmp.lt.s32.totalorder %s2192_s16, %s2192_s16 }
  0x1d   :  { %p2199_p0 = por %p2198_p13, %p2197_p12 }
  0x1f   :  { %p2200_p1 = pnand %p2199_p0, %p2193_p11 }
  0x21   :  { %2203 = shalt.err (!%p2200_p1)
}
  0x22   :  { %s2258_s1 = smov 768   ;;  %s2259_s17 = smov 48  }
  0x23   :  { %24 = dma.hbm_to_vmem [thread:$0]  %s2369_s0, 1536, %s19_s8, [#allocation3], %s2258_s1, %s2258_s1, %s2259_s17  }
  0x24   :  { %s2260_s20 = smov [#allocation7]   ;;  %s2204_s24 = scalar_lea.hbm %s2372_s3, 3072 }
  0x25   :  { %s44_s21 = sshll.u32 %s2260_s20, 4  ;;  %p2205_p2 = scmp.ne.s32.totalorder %s2372_s3, %s2204_s24  ;;  %s45_s21 = int_to_ptr.vmem [resolvable:$true] %s44_s21 }
  0x26   :  { %p2208_p3 = scmp.lt.u32.totalorder %s2204_s24, %s2372_s3 }
  0x28   :  { %p2210_p4 = pnand %p2208_p3, %p2205_p2 }
  0x2a   :  { %2213 = shalt.err (!%p2210_p4)
}
  0x2b   :  { %s2214_s29 = scalar_lea.vmem %s45_s21, 3072  ;;  %p2219_p6 = scmp.lt.s32.totalorder %s45_s21, %s45_s21 }
  0x2c   :  { %p2215_p5 = scmp.ne.s32.totalorder %s45_s21, %s2214_s29  ;;  %p2220_p7 = scmp.lt.s32.totalorder %s2214_s29, %s2214_s29 }
  0x2e   :  { %p2221_p8 = por %p2220_p7, %p2219_p6 }
  0x30   :  { %p2222_p9 = pnand %p2221_p8, %p2215_p5 }
  0x32   :  { %2225 = shalt.err (!%p2222_p9)
}
  0x33   :  { %s2261_s0 = smov 64   ;;  %s2262_s30 = smov 4  }
  0x34   :  { %50 = dma.hbm_to_vmem [thread:$0]  %s2372_s3, 3072, %s45_s21, [#allocation6], %s2261_s0, %s2261_s0, %s2262_s30  }
  0x35   :  { %2248 = dma.done.wait [#allocation3], 1536  }
  0x36   :  { %2249 = vsyncadd [#allocation3], 4294965760 }
  0x37   :  { %2250 = dma.done.wait [#allocation6], 21504  }
  0x38   :  { %2251 = vsyncadd [#allocation6], 4294945792  ;;  %v1944_v0 = vld [vmem:[#allocation5 + $0x4] ss:$12 sps:$4 sm:$0xff]   ;;  %v1946_v1 = vld [vmem:[#allocation5] ss:$12 sps:$4 sm:$0xff]  }
  0x39   :  { %1070 = vmatprep.subr.bf16.mxu0 %v1944_v0  ;;  %v1947_v2 = vld [vmem:[#allocation5 + $0x1c] ss:$12 sps:$4 sm:$0xff]   ;;  %v1949_v3 = vld [vmem:[#allocation5 + $0x18] ss:$12 sps:$4 sm:$0xff]   ;;  %v1950_v4 = vld [vmem:[#allocation5 + $0x34] ss:$12 sps:$4 sm:$0xff]  }
  0x3a   :  { %1071 = vmatpush1.bf16.msra.mxu0 %v1946_v1  ;;  %v1952_v5 = vld [vmem:[#allocation5 + $0x30] ss:$12 sps:$4 sm:$0xff]   ;;  %v1953_v6 = vld [vmem:[#allocation5 + $0x4c] ss:$12 sps:$4 sm:$0xff]   ;;  %v1955_v7 = vld [vmem:[#allocation5 + $0x48] ss:$12 sps:$4 sm:$0xff]  }
  0x3b   :  { %1072 = vmatprep.subr.bf16.mxu0 %v1947_v2  ;;  %v1956_v8 = vld [vmem:[#allocation5 + $0x64] ss:$12 sps:$4 sm:$0xff]   ;;  %v1958_v9 = vld [vmem:[#allocation5 + $0x60] ss:$12 sps:$4 sm:$0xff]   ;;  %v1959_v10 = vld [vmem:[#allocation5 + $0x7c] ss:$12 sps:$4 sm:$0xff]  }
  0x3c   :  { %v1961_v11 = vld [vmem:[#allocation5 + $0x78] ss:$12 sps:$4 sm:$0xff]   ;;  %v1962_v12 = vld [vmem:[#allocation5 + $0x94] ss:$12 sps:$4 sm:$0xff]   ;;  %v64_v13 = vld [vmem:[#allocation2 + $0x8] sm:$0xff]  ;;  %vm2264_vm0 = vmmov 0  }
  0x3d   :  { %v70_v14 = vld [vmem:[#allocation2 + $0x38] sm:$0xff]  ;;  %v76_v15 = vmax.f32 %v64_v13, 0.0  ;;  %v1995_v20 = vld [vmem:[#allocation5 + $0xc8] ss:$12 sps:$4 sm:$0xff]   ;;  %v1968_v23 = vld [vmem:[#allocation5 + $0xc4] ss:$12 sps:$4 sm:$0xff]  }
  0x3e   :  { %1073 = vmatpush1.bf16.msra.mxu0 %v1949_v3  ;;  %v82_v16 = vmax.f32 %v70_v14, 0.0  ;;  %v1964_v17 = vld [vmem:[#allocation5 + $0x90] ss:$12 sps:$4 sm:$0xff]   ;;  %v1965_v18 = vld [vmem:[#allocation5 + $0xac] ss:$12 sps:$4 sm:$0xff]   ;;  %1801 = vmatprep.subr.bf16.mxu1 %v1995_v20  ;;  %v63_v48 = vld [vmem:[#allocation2] sm:$0xff] }
  0x3f   :  { %1074 = vmatprep.subr.bf16.mxu0 %v1950_v4  ;;  %v1996_v21 = vld [vmem:[#allocation5 + $0x8] ss:$12 sps:$4 sm:$0xff]   ;;  %v2000_v24 = vld [vmem:[#allocation5 + $0xe0] ss:$12 sps:$4 sm:$0xff]   ;;  %v2005_v28 = vld [vmem:[#allocation5 + $0xf8] ss:$12 sps:$4 sm:$0xff]  }
  0x40   :  { %v88_v19 = vpack.c.bf16 %v82_v16, %v76_v15  ;;  %v1967_v22 = vld [vmem:[#allocation5 + $0xa8] ss:$12 sps:$4 sm:$0xff]   ;;  %1802 = vmatpush3.bf16.msra.mxu1 %v1996_v21  ;;  %v2001_v25 = vld [vmem:[#allocation5 + $0x20] ss:$12 sps:$4 sm:$0xff]   ;;  %v2006_v29 = vld [vmem:[#allocation5 + $0x38] ss:$12 sps:$4 sm:$0xff]  }
  0x41   :  { %v1970_v26 = vld [vmem:[#allocation5 + $0xc0] ss:$12 sps:$4 sm:$0xff]   ;;  %v1971_v27 = vld [vmem:[#allocation5 + $0xdc] ss:$12 sps:$4 sm:$0xff]   ;;  %1803 = vmatprep.subr.bf16.mxu1 %v2000_v24  ;;  %v1973_v30 = vld [vmem:[#allocation5 + $0xd8] ss:$12 sps:$4 sm:$0xff]  }
  0x42   :  { %1075 = vmatpush1.bf16.msra.mxu0 %v1952_v5  ;;  %1102 = vmatprep.mubr.bf16.mxu0 %v88_v19  ;;  %v1974_v31 = vld [vmem:[#allocation5 + $0xf4] ss:$12 sps:$4 sm:$0xff]   ;;  %v2010_v32 = vld [vmem:[#allocation5 + $0x110] ss:$12 sps:$4 sm:$0xff]   ;;  %v1977_v36 = vld [vmem:[#allocation5 + $0x10c] ss:$12 sps:$4 sm:$0xff]  }
  0x43   :  { %1076 = vmatprep.subr.bf16.mxu0 %v1953_v6  ;;  %1231 = vmatprep.mubr.bf16.mxu1 %v88_v19  ;;  %v2011_v33 = vld [vmem:[#allocation5 + $0x50] ss:$12 sps:$4 sm:$0xff]   ;;  %v2015_v34 = vld [vmem:[#allocation5 + $0x128] ss:$12 sps:$4 sm:$0xff]   ;;  %v2020_v38 = vld [vmem:[#allocation5 + $0x140] ss:$12 sps:$4 sm:$0xff]  }
  0x44   :  { %1804 = vmatpush3.bf16.msra.mxu1 %v2001_v25  ;;  %v1976_v35 = vld [vmem:[#allocation5 + $0xf0] ss:$12 sps:$4 sm:$0xff]   ;;  %v2016_v37 = vld [vmem:[#allocation5 + $0x68] ss:$12 sps:$4 sm:$0xff]   ;;  %v2021_v41 = vld [vmem:[#allocation5 + $0x80] ss:$12 sps:$4 sm:$0xff]  }
  0x45   :  { %1805 = vmatprep.subr.bf16.mxu1 %v2005_v28  ;;  %v1979_v39 = vld [vmem:[#allocation5 + $0x108] ss:$12 sps:$4 sm:$0xff]   ;;  %v1980_v40 = vld [vmem:[#allocation5 + $0x124] ss:$12 sps:$4 sm:$0xff]   ;;  %v1982_v43 = vld [vmem:[#allocation5 + $0x120] ss:$12 sps:$4 sm:$0xff]  }
  0x46   :  { %1077 = vmatpush1.bf16.msra.mxu0 %v1955_v7  ;;  %v2025_v42 = vld [vmem:[#allocation5 + $0x158] ss:$12 sps:$4 sm:$0xff]   ;;  %v1983_v44 = vld [vmem:[#allocation5 + $0x13c] ss:$12 sps:$4 sm:$0xff]   ;;  %v69_v49 = vld [vmem:[#allocation2 + $0x30] sm:$0xff]  ;;  %v75_v52 = vmax.f32 %v63_v48, 0.0 }
  0x47   :  { %1078 = vmatprep.subr.bf16.mxu0 %v1956_v8  ;;  %v2026_v45 = vld [vmem:[#allocation5 + $0x98] ss:$12 sps:$4 sm:$0xff]   ;;  %v2030_v47 = vld [vmem:[#allocation5 + $0x170] ss:$12 sps:$4 sm:$0xff]   ;;  %v1986_v50 = vld [vmem:[#allocation5 + $0x154] ss:$12 sps:$4 sm:$0xff]  }
  0x48   :  { %1806 = vmatpush3.bf16.msra.mxu1 %v2006_v29  ;;  %v1985_v46 = vld [vmem:[#allocation5 + $0x138] ss:$12 sps:$4 sm:$0xff]   ;;  %v2031_v51 = vld [vmem:[#allocation5 + $0xb0] ss:$12 sps:$4 sm:$0xff]   ;;  %v81_v53 = vmax.f32 %v69_v49, 0.0  ;;  %v72_v16 = vld [vmem:[#allocation2 + $0x48] sm:$0xff] }
  0x49   :  { %1807 = vmatprep.subr.bf16.mxu1 %v2010_v32  ;;  %v2035_v54 = vld [vmem:[#allocation5 + $0x248] ss:$12 sps:$4 sm:$0xff]   ;;  %v1988_v55 = vld [vmem:[#allocation5 + $0x150] ss:$12 sps:$4 sm:$0xff]   ;;  %v1989_v56 = vld [vmem:[#allocation5 + $0x16c] ss:$12 sps:$4 sm:$0xff]  }
  0x4a   :  { %1079 = vmatpush1.bf16.msra.mxu0 %v1958_v9  ;;  %v2036_v57 = vld [vmem:[#allocation5 + $0x188] ss:$12 sps:$4 sm:$0xff]   ;;  %v87_v58 = vpack.c.bf16 %v81_v53, %v75_v52  ;;  %v2040_v59 = vld [vmem:[#allocation5 + $0x260] ss:$12 sps:$4 sm:$0xff]   ;;  %v1994_v61 = vld [vmem:[#allocation5 + $0x184] ss:$12 sps:$4 sm:$0xff]  }
  0x4b   :  { %1080 = vmatprep.subr.bf16.mxu0 %v1959_v10  ;;  %v1991_v60 = vld [vmem:[#allocation5 + $0x168] ss:$12 sps:$4 sm:$0xff]   ;;  %v2041_v62 = vld [vmem:[#allocation5 + $0x1a0] ss:$12 sps:$4 sm:$0xff]   ;;  %v2045_v63 = vld [vmem:[#allocation5 + $0x278] ss:$12 sps:$4 sm:$0xff]  }
  0x4c   :  { %1808 = vmatpush3.bf16.msra.mxu1 %v2011_v33  ;;  %v1992_v0 = vld [vmem:[#allocation5 + $0x180] ss:$12 sps:$4 sm:$0xff]   ;;  %v1999_v1 = vld [vmem:[#allocation5 + $0x19c] ss:$12 sps:$4 sm:$0xff]   ;;  %v2046_v2 = vld [vmem:[#allocation5 + $0x1b8] ss:$12 sps:$4 sm:$0xff]  }
  0x4d   :  { %1809 = vmatprep.subr.bf16.mxu1 %v2015_v34  ;;  %v2050_v3 = vld [vmem:[#allocation5 + $0x290] ss:$12 sps:$4 sm:$0xff]   ;;  %v1997_v4 = vld [vmem:[#allocation5 + $0x198] ss:$12 sps:$4 sm:$0xff]   ;;  %v2004_v5 = vld [vmem:[#allocation5 + $0x1b4] ss:$12 sps:$4 sm:$0xff]  }
  0x4e   :  { %1081 = vmatpush1.bf16.msra.mxu0 %v1961_v11  ;;  %v2051_v6 = vld [vmem:[#allocation5 + $0x1d0] ss:$12 sps:$4 sm:$0xff]   ;;  %v2055_v7 = vld [vmem:[#allocation5 + $0x2a8] ss:$12 sps:$4 sm:$0xff]   ;;  %v2009_v9 = vld [vmem:[#allocation5 + $0x1cc] ss:$12 sps:$4 sm:$0xff]  }
  0x4f   :  { %1082 = vmatprep.subr.bf16.mxu0 %v1962_v12  ;;  %v2002_v8 = vld [vmem:[#allocation5 + $0x1b0] ss:$12 sps:$4 sm:$0xff]   ;;  %v2056_v10 = vld [vmem:[#allocation5 + $0x1e8] ss:$12 sps:$4 sm:$0xff]   ;;  %v2060_v11 = vld [vmem:[#allocation5 + $0x2c0] ss:$12 sps:$4 sm:$0xff]  }
  0x50   :  { %1810 = vmatpush3.bf16.msra.mxu1 %v2016_v37  ;;  %v2007_v12 = vld [vmem:[#allocation5 + $0x1c8] ss:$12 sps:$4 sm:$0xff]   ;;  %v2014_v13 = vld [vmem:[#allocation5 + $0x1e4] ss:$12 sps:$4 sm:$0xff]   ;;  %v2061_v14 = vld [vmem:[#allocation5 + $0x200] ss:$12 sps:$4 sm:$0xff]  }
  0x51   :  { %1811 = vmatprep.subr.bf16.mxu1 %v2020_v38  ;;  %v66_v15 = vld [vmem:[#allocation2 + $0x18] sm:$0xff]  ;;  %v84_v19 = vmax.f32 %v72_v16, 0.0  ;;  %v2012_v20 = vld [vmem:[#allocation5 + $0x1e0] ss:$12 sps:$4 sm:$0xff]   ;;  %v65_v24 = vld [vmem:[#allocation2 + $0x10] sm:$0xff]  ;;  %s2265_s10 = smov [#allocation8]  }
  0x52   :  { %1083 = vmatpush1.bf16.msra.mxu0 %v1964_v17  ;;  %v2065_v17 = vld [vmem:[#allocation5 + $0x2d8] ss:$12 sps:$4 sm:$0xff]   ;;  %v2019_v21 = vld [vmem:[#allocation5 + $0x1fc] ss:$12 sps:$4 sm:$0xff]   ;;  %v2024_v28 = vld [vmem:[#allocation5 + $0x214] ss:$12 sps:$4 sm:$0xff]  }
  0x53   :  { %1084 = vmatprep.subr.bf16.mxu0 %v1965_v18  ;;  %v78_v18 = vmax.f32 %v66_v15, 0.0  ;;  %v71_v25 = vld [vmem:[#allocation2 + $0x40] sm:$0xff]  ;;  %v77_v29 = vmax.f32 %v65_v24, 0.0  ;;  %v2075_v32 = vld [vmem:[#allocation5 + $0x3c8] ss:$12 sps:$4 sm:$0xff]   ;;  %s1619_s11 = sshll.u32 %s2265_s10, 4  ;;  %s1620_s11 = int_to_ptr.vmem [resolvable:$true] %s1619_s11 }
  0x54   :  { %1812 = vmatpush3.bf16.msra.mxu1 %v2021_v41  ;;  %v2022_v33 = vld [vmem:[#allocation5 + $0x210] ss:$12 sps:$4 sm:$0xff]   ;;  %v2029_v34 = vld [vmem:[#allocation5 + $0x22c] ss:$12 sps:$4 sm:$0xff]   ;;  %v2027_v38 = vld [vmem:[#allocation5 + $0x228] ss:$12 sps:$4 sm:$0xff]   ;;  %p2231_p11 = scmp.lt.s32.totalorder %s1620_s11, %s1620_s11 }
  0x55   :  { %1813 = vmatprep.subr.bf16.mxu1 %v2025_v42  ;;  %v2080_v37 = vld [vmem:[#allocation5 + $0x3e0] ss:$12 sps:$4 sm:$0xff]   ;;  %v2085_v41 = vld [vmem:[#allocation5 + $0x3f8] ss:$12 sps:$4 sm:$0xff]   ;;  %v2091_v48 = vld [vmem:[#allocation5 + $0x350] ss:$12 sps:$4 sm:$0xff]  }
  0x56   :  { %1085 = vmatpush1.bf16.msra.mxu0 %v1967_v22  ;;  %v2066_v22 = vld [vmem:[#allocation5 + $0x218] ss:$12 sps:$4 sm:$0xff]   ;;  %v2032_v42 = vld [vmem:[#allocation5 + $0x240] ss:$12 sps:$4 sm:$0xff]   ;;  %v2095_v49 = vld [vmem:[#allocation5 + $0x428] ss:$12 sps:$4 sm:$0xff]  }
  0x57   :  { %1086 = vmatprep.subr.bf16.mxu0 %v1968_v23  ;;  %v90_v23 = vpack.c.bf16 %v84_v19, %v78_v18  ;;  %v2096_v52 = vld [vmem:[#allocation5 + $0x368] ss:$12 sps:$4 sm:$0xff]   ;;  %v2100_v53 = vld [vmem:[#allocation5 + $0x440] ss:$12 sps:$4 sm:$0xff]   ;;  %v2082_v19 = vld [vmem:[#allocation5 + $0x330] ss:$12 sps:$4 sm:$0xff]  }
  0x58   :  { %1814 = vmatpush3.bf16.msra.mxu1 %v2026_v45  ;;  %v2090_v45 = vld [vmem:[#allocation5 + $0x410] ss:$12 sps:$4 sm:$0xff]   ;;  %v2072_v15 = vld [vmem:[#allocation5 + $0x300] ss:$12 sps:$4 sm:$0xff]   ;;  %s2226_s12 = scalar_lea.vmem %s1620_s11, 256 }
  0x59   :  { %1815 = vmatprep.subr.bf16.mxu1 %v2030_v47  ;;  %v2044_v47 = vld [vmem:[#allocation5 + $0x274] ss:$12 sps:$4 sm:$0xff]   ;;  %v2079_v16 = vld [vmem:[#allocation5 + $0x31c] ss:$12 sps:$4 sm:$0xff]   ;;  %p2227_p10 = scmp.ne.s32.totalorder %s1620_s11, %s2226_s12  ;;  %p2232_p12 = scmp.lt.s32.totalorder %s2226_s12, %s2226_s12 }
  0x5a   :  { %1087 = vmatpush1.bf16.msra.mxu0 %v1970_v26  ;;  %v2070_v26 = vld [vmem:[#allocation5 + $0x2f0] ss:$12 sps:$4 sm:$0xff]   ;;  %v2084_v18 = vld [vmem:[#allocation5 + $0x334] ss:$12 sps:$4 sm:$0xff]  }
  0x5b   :  { %1088 = vmatprep.subr.bf16.mxu0 %v1971_v27  ;;  %v2017_v27 = vld [vmem:[#allocation5 + $0x1f8] ss:$12 sps:$4 sm:$0xff]   ;;  %v2099_v24 = vld [vmem:[#allocation5 + $0x37c] ss:$12 sps:$4 sm:$0xff]   ;;  %p2233_p13 = por %p2232_p12, %p2231_p11 }
  0x5c   :  { %1816 = vmatpush3.bf16.msra.mxu1 %v2031_v51  ;;  %v2049_v51 = vld [vmem:[#allocation5 + $0x28c] ss:$12 sps:$4 sm:$0xff]  }
  0x5d   :  { %1823 = vmatprep.subr.bf16.mxu1 %v2035_v54  ;;  %v68_v54 = vld [vmem:[#allocation2 + $0x28] sm:$0xff]  ;;  %p2234_p0 = pnand %p2233_p13, %p2227_p10 }
  0x5e   :  { %1089 = vmatpush1.bf16.msra.mxu0 %v1973_v30  ;;  %v83_v30 = vmax.f32 %v71_v25, 0.0  ;;  %v2097_v25 = vld [vmem:[#allocation5 + $0x378] ss:$12 sps:$4 sm:$0xff]  }
  0x5f   :  { %1090 = vmatprep.subr.bf16.mxu0 %v1974_v31  ;;  %1232 = vmatmul.mubr.bf16.vlgmr.msra.gmra.mrb[0].mxu1 %v87_v58  ;;  %v2071_v31 = vld [vmem:[#allocation5 + $0x230] ss:$12 sps:$4 sm:$0xff]  }
  0x60   :  { %1824 = vmatpush3.bf16.msra.mxu1 %v2036_v57  ;;  %1272 = vmatprep.mubr.bf16.mxu1 %v90_v23 }
  0x61   :  { %1825 = vmatprep.subr.bf16.mxu1 %v2040_v59  ;;  %v2054_v59 = vld [vmem:[#allocation5 + $0x2a4] ss:$12 sps:$4 sm:$0xff]  }
  0x62   :  { %1091 = vmatpush1.bf16.msra.mxu0 %v1976_v35  ;;  %v2334_v35 = vpack.c.bf16 %v83_v30, %v77_v29  ;;  %v2107_v29 = vld [vmem:[#allocation5 + $0x3a8] ss:$12 sps:$4 sm:$0xff]   ;;  %v2114_v30 = vld [vmem:[#allocation5 + $0x3c4] ss:$12 sps:$4 sm:$0xff]  }
  0x63   :  { %1092 = vmatprep.subr.bf16.mxu0 %v1977_v36  ;;  %v2076_v36 = vld [vmem:[#allocation5 + $0x308] ss:$12 sps:$4 sm:$0xff]  }
  0x64   :  { %1826 = vmatpush3.bf16.msra.mxu1 %v2041_v62  ;;  %v2052_v62 = vld [vmem:[#allocation5 + $0x2a0] ss:$12 sps:$4 sm:$0xff]  }
  0x65   :  { %1827 = vmatprep.subr.bf16.mxu1 %v2045_v63  ;;  %v2105_v63 = vld [vmem:[#allocation5 + $0x458] ss:$12 sps:$4 sm:$0xff]  }
  0x66   :  { %1093 = vmatpush1.bf16.msra.mxu0 %v1979_v39  ;;  %v2034_v39 = vld [vmem:[#allocation5 + $0x244] ss:$12 sps:$4 sm:$0xff]  }
  0x67   :  { %1094 = vmatprep.subr.bf16.mxu0 %v1980_v40  ;;  %v2081_v40 = vld [vmem:[#allocation5 + $0x320] ss:$12 sps:$4 sm:$0xff]  }
  0x68   :  { %1828 = vmatpush3.bf16.msra.mxu1 %v2046_v2  ;;  %v67_v2 = vld [vmem:[#allocation2 + $0x20] sm:$0xff] }
  0x69   :  { %1829 = vmatprep.subr.bf16.mxu1 %v2050_v3  ;;  %v73_v3 = vld [vmem:[#allocation2 + $0x50] sm:$0xff] }
  0x6a   :  { %1095 = vmatpush1.bf16.msra.mxu0 %v1982_v43  ;;  %v2039_v43 = vld [vmem:[#allocation5 + $0x25c] ss:$12 sps:$4 sm:$0xff]  }
  0x6b   :  { %1096 = vmatprep.subr.bf16.mxu0 %v1983_v44  ;;  %v2086_v44 = vld [vmem:[#allocation5 + $0x338] ss:$12 sps:$4 sm:$0xff]  }
  0x6c   :  { %1830 = vmatpush3.bf16.msra.mxu1 %v2051_v6  ;;  %v79_v6 = vmax.f32 %v67_v2, 0.0  ;;  %v2150_v2 = vld [vmem:[#allocation7 + $0x78] sm:$0xff]  }
  0x6d   :  { %1831 = vmatprep.subr.bf16.mxu1 %v2055_v7  ;;  %v85_v7 = vmax.f32 %v73_v3, 0.0  ;;  %v2151_v3 = vld [vmem:[#allocation7 + $0x38] sm:$0xff]  }
  0x6e   :  { %1097 = vmatpush1.bf16.msra.mxu0 %v1985_v46  ;;  %v2037_v46 = vld [vmem:[#allocation5 + $0x258] ss:$12 sps:$4 sm:$0xff]  }
  0x6f   :  { %1098 = vmatprep.subr.bf16.mxu0 %v1986_v50  ;;  %v2042_v50 = vld [vmem:[#allocation5 + $0x270] ss:$12 sps:$4 sm:$0xff]  }
  0x70   :  { %1832 = vmatpush3.bf16.msra.mxu1 %v2056_v10  ;;  %v2062_v10 = vld [vmem:[#allocation5 + $0x2d0] ss:$12 sps:$4 sm:$0xff]  }
  0x71   :  { %1833 = vmatprep.subr.bf16.mxu1 %v2060_v11  ;;  %v2069_v11 = vld [vmem:[#allocation5 + $0x2ec] ss:$12 sps:$4 sm:$0xff]  }
  0x72   :  { %1099 = vmatpush1.bf16.msra.mxu0 %v1988_v55  ;;  %v74_v55 = vld [vmem:[#allocation2 + $0x58] sm:$0xff] }
  0x73   :  { %1100 = vmatprep.subr.bf16.mxu0 %v1989_v56  ;;  %v80_v56 = vmax.f32 %v68_v54, 0.0  ;;  %v86_v57 = vmax.f32 %v74_v55, 0.0  ;;  %v2144_v54 = vld [vmem:[#allocation7 + $0x60] sm:$0xff]  }
  0x74   :  { %1834 = vmatpush3.bf16.msra.mxu1 %v2061_v14  ;;  %v2074_v14 = vld [vmem:[#allocation5 + $0x304] ss:$12 sps:$4 sm:$0xff]  }
  0x75   :  { %1835 = vmatprep.subr.bf16.mxu1 %v2065_v17  ;;  %v2077_v17 = vld [vmem:[#allocation5 + $0x318] ss:$12 sps:$4 sm:$0xff]  }
  0x76   :  { %1101 = vmatpush1.bf16.msra.mxu0 %v1991_v60  ;;  %v2101_v60 = vld [vmem:[#allocation5 + $0x380] ss:$12 sps:$4 sm:$0xff]  }
  0x77   :  { %1113 = vmatprep.subr.bf16.mxu0 %v1994_v61  ;;  %v92_v61 = vpack.c.bf16 %v86_v57, %v80_v56  ;;  %v2145_v55 = vld [vmem:[#allocation7 + $0x20] sm:$0xff]   ;;  %v2146_v56 = vld [vmem:[#allocation7 + $0x68] sm:$0xff]  }
  0x78   :  { %1836 = vmatpush3.bf16.msra.mxu1 %v2066_v22  ;;  %v2094_v22 = vld [vmem:[#allocation5 + $0x364] ss:$12 sps:$4 sm:$0xff]   ;;  %v2147_v57 = vld [vmem:[#allocation7 + $0x28] sm:$0xff]  }
  0x79   :  { %1103 = vmatmul.mubr.bf16.vlgmr.msra.gmra.mrb[0].mxu0 %v87_v58  ;;  %1837 = vmatprep.subr.bf16.mxu1 %v2070_v26  ;;  %v2047_v58 = vld [vmem:[#allocation5 + $0x288] ss:$12 sps:$4 sm:$0xff]  }
  0x7a   :  { %1114 = vmatpush1.bf16.msra.mxu0 %v1992_v0  ;;  %1145 = vmatprep.mubr.bf16.mxu0 %v90_v23  ;;  %v2059_v0 = vld [vmem:[#allocation5 + $0x2bc] ss:$12 sps:$4 sm:$0xff]   ;;  %v2092_v23 = vld [vmem:[#allocation5 + $0x360] ss:$12 sps:$4 sm:$0xff]  }
  0x7b   :  { %1115 = vmatprep.subr.bf16.mxu0 %v1999_v1  ;;  %v2106_v1 = vld [vmem:[#allocation5 + $0x398] ss:$12 sps:$4 sm:$0xff]   ;;  %v2104_v26 = vld [vmem:[#allocation5 + $0x394] ss:$12 sps:$4 sm:$0xff]  }
  0x7c   :  { %1838 = vmatpush3.bf16.msra.mxu1 %v2071_v31  ;;  %v2112_v31 = vld [vmem:[#allocation5 + $0x3c0] ss:$12 sps:$4 sm:$0xff]  }
  0x7d   :  { %1845 = vmatprep.subr.bf16.mxu1 %v2075_v32  ;;  %v2117_v32 = vld [vmem:[#allocation5 + $0x3dc] ss:$12 sps:$4 sm:$0xff]  }
  0x7e   :  { %1116 = vmatpush1.bf16.msra.mxu0 %v1997_v4  ;;  %v2110_v4 = vld [vmem:[#allocation5 + $0x470] ss:$12 sps:$4 sm:$0xff]  }
  0x7f   :  { %1117 = vmatprep.subr.bf16.mxu0 %v2004_v5  ;;  %1273 = vmatmul.mubr.bf16.vlgmr.msra.gmra.mrb[4].mxu1 %v2334_v35  ;;  %v2057_v5 = vld [vmem:[#allocation5 + $0x2b8] ss:$12 sps:$4 sm:$0xff]  }
  0x80   :  { %1846 = vmatpush3.bf16.msra.mxu1 %v2076_v36  ;;  %1313 = vmatprep.mubr.bf16.mxu1 %v92_v61  ;;  %v2123_v36 = vld [vmem:[#allocation5 + $0x40c] ss:$12 sps:$4 sm:$0xff]  }
  0x81   :  { %1847 = vmatprep.subr.bf16.mxu1 %v2080_v37  ;;  %v2121_v37 = vld [vmem:[#allocation5 + $0x408] ss:$12 sps:$4 sm:$0xff]  }
  0x82   :  { %1118 = vmatpush1.bf16.msra.mxu0 %v2002_v8  ;;  %v2064_v8 = vld [vmem:[#allocation5 + $0x2d4] ss:$12 sps:$4 sm:$0xff]  }
  0x83   :  { %1119 = vmatprep.subr.bf16.mxu0 %v2009_v9  ;;  %v2111_v9 = vld [vmem:[#allocation5 + $0x3b0] ss:$12 sps:$4 sm:$0xff]  }
  0x84   :  { %1848 = vmatpush3.bf16.msra.mxu1 %v2081_v40  ;;  %v2129_v40 = vld [vmem:[#allocation5 + $0x43c] ss:$12 sps:$4 sm:$0xff]  }
  0x85   :  { %1849 = vmatprep.subr.bf16.mxu1 %v2085_v41  ;;  %v2127_v41 = vld [vmem:[#allocation5 + $0x438] ss:$12 sps:$4 sm:$0xff]  }
  0x86   :  { %1120 = vmatpush1.bf16.msra.mxu0 %v2007_v12  ;;  %v2337_v12 = vpack.c.bf16 %v85_v7, %v79_v6 }
  0x87   :  { %1121 = vmatprep.subr.bf16.mxu0 %v2014_v13  ;;  %v2067_v13 = vld [vmem:[#allocation5 + $0x2e8] ss:$12 sps:$4 sm:$0xff]  }
  0x88   :  { %1850 = vmatpush3.bf16.msra.mxu1 %v2086_v44  ;;  %v2135_v44 = vld [vmem:[#allocation5 + $0x46c] ss:$12 sps:$4 sm:$0xff]  }
  0x89   :  { %1851 = vmatprep.subr.bf16.mxu1 %v2090_v45  ;;  %v2133_v45 = vld [vmem:[#allocation5 + $0x468] ss:$12 sps:$4 sm:$0xff]  }
  0x8a   :  { %1122 = vmatpush1.bf16.msra.mxu0 %v2012_v20  ;;  %v2089_v20 = vld [vmem:[#allocation5 + $0x34c] ss:$12 sps:$4 sm:$0xff]  }
  0x8b   :  { %1123 = vmatprep.subr.bf16.mxu0 %v2019_v21  ;;  %v2087_v21 = vld [vmem:[#allocation5 + $0x348] ss:$12 sps:$4 sm:$0xff]  }
  0x8c   :  { %1852 = vmatpush3.bf16.msra.mxu1 %v2091_v48  ;;  %v2138_v48 = vld [vmem:[#allocation7 + $0x48] sm:$0xff]  }
  0x8d   :  { %1853 = vmatprep.subr.bf16.mxu1 %v2095_v49  ;;  %v2139_v49 = vld [vmem:[#allocation7 + $0x8] sm:$0xff]  }
  0x8e   :  { %1124 = vmatpush1.bf16.msra.mxu0 %v2017_v27  ;;  %v2102_v27 = vld [vmem:[#allocation5 + $0x390] ss:$12 sps:$4 sm:$0xff]  }
  0x8f   :  { %1125 = vmatprep.subr.bf16.mxu0 %v2024_v28  ;;  %v2109_v28 = vld [vmem:[#allocation5 + $0x3ac] ss:$12 sps:$4 sm:$0xff]  }
  0x90   :  { %1854 = vmatpush3.bf16.msra.mxu1 %v2096_v52  ;;  %v2142_v52 = vld [vmem:[#allocation7 + $0x58] sm:$0xff]  }
  0x91   :  { %1855 = vmatprep.subr.bf16.mxu1 %v2100_v53  ;;  %v2143_v53 = vld [vmem:[#allocation7 + $0x18] sm:$0xff]  }
  0x92   :  { %1126 = vmatpush1.bf16.msra.mxu0 %v2022_v33  ;;  %v2115_v33 = vld [vmem:[#allocation5 + $0x3d8] ss:$12 sps:$4 sm:$0xff]  }
  0x93   :  { %1127 = vmatprep.subr.bf16.mxu0 %v2029_v34  ;;  %v2120_v34 = vld [vmem:[#allocation5 + $0x3f4] ss:$12 sps:$4 sm:$0xff]  }
  0x94   :  { %1856 = vmatpush3.bf16.msra.mxu1 %v2101_v60 }
  0x95   :  { %1857 = vmatprep.subr.bf16.mxu1 %v2105_v63 }
  0x96   :  { %1128 = vmatpush1.bf16.msra.mxu0 %v2027_v38  ;;  %v2126_v38 = vld [vmem:[#allocation5 + $0x424] ss:$12 sps:$4 sm:$0xff]  }
  0x97   :  { %1129 = vmatprep.subr.bf16.mxu0 %v2034_v39  ;;  %v2124_v39 = vld [vmem:[#allocation5 + $0x420] ss:$12 sps:$4 sm:$0xff]  }
  0x98   :  { %1858 = vmatpush3.bf16.msra.mxu1 %v2106_v1  ;;  %v2149_v1 = vld [vmem:[#allocation7 + $0x30] sm:$0xff]  }
  0x99   :  { %1859 = vmatprep.subr.bf16.mxu1 %v2110_v4  ;;  %v287_v4 = vlaneseq }
  0x9a   :  { %1130 = vmatpush1.bf16.msra.mxu0 %v2032_v42  ;;  %v2132_v42 = vld [vmem:[#allocation5 + $0x454] ss:$12 sps:$4 sm:$0xff]  }
  0x9b   :  { %1131 = vmatprep.subr.bf16.mxu0 %v2039_v43  ;;  %v2130_v43 = vld [vmem:[#allocation5 + $0x450] ss:$12 sps:$4 sm:$0xff]   ;;  %v288_v6 = vshrl.u32 %v287_v4, 7 }
  0x9c   :  { %1860 = vmatpush3.bf16.msra.mxu1 %v2111_v9 }
  0x9d   :  { %v297_v7 = vsub.s32 2, %v288_v6 }
  0x9e   :  { %1132 = vmatpush1.bf16.msra.mxu0 %v2037_v46  ;;  %v2136_v46 = vld [vmem:[#allocation7 + $0x40] sm:$0xff]  }
  0x9f   :  { %1133 = vmatprep.subr.bf16.mxu0 %v2044_v47  ;;  %1314 = vmatmul.mubr.bf16.vlgmr.msra.gmra.mrb[8].mxu1 %v2337_v12  ;;  %v2137_v47 = vld [vmem:[#allocation7] sm:$0xff]  }
  0xa0   :  { %1867 = vmatprep.subr.bf16.mxu1 %v2136_v46 }
  0xa1   :  { %1868 = vmatpush3.bf16.msra.mxu1 %v2137_v47 }
  0xa2   :  { %1134 = vmatpush1.bf16.msra.mxu0 %v2042_v50  ;;  %1869 = vmatprep.subr.bf16.mxu1 %v2138_v48  ;;  %v2140_v50 = vld [vmem:[#allocation7 + $0x50] sm:$0xff]  }
  0xa3   :  { %1135 = vmatprep.subr.bf16.mxu0 %v2049_v51  ;;  %v2141_v51 = vld [vmem:[#allocation7 + $0x10] sm:$0xff]  }
  0xa5   :  { %1870 = vmatpush3.bf16.msra.mxu1 %v2139_v49  ;;  %v2152_v49 = vld [vmem:[#allocation7 + $0x80] sm:$0xff]  }
  0xa6   :  { %1136 = vmatpush1.bf16.msra.mxu0 %v2047_v58  ;;  %1871 = vmatprep.subr.bf16.mxu1 %v2140_v50  ;;  %v2153_v50 = vld [vmem:[#allocation7 + $0x88] sm:$0xff]  }
  0xa7   :  { %1137 = vmatprep.subr.bf16.mxu0 %v2054_v59 }
  0xa9   :  { %1872 = vmatpush3.bf16.msra.mxu1 %v2141_v51  ;;  %v2154_v51 = vld [vmem:[#allocation7 + $0x90] sm:$0xff]  }
  0xaa   :  { %1138 = vmatpush1.bf16.msra.mxu0 %v2052_v62  ;;  %1873 = vmatprep.subr.bf16.mxu1 %v2142_v52  ;;  %v2155_v52 = vld [vmem:[#allocation7 + $0x98] sm:$0xff]  }
  0xab   :  { %1139 = vmatprep.subr.bf16.mxu0 %v2059_v0  ;;  %v2148_v0 = vld [vmem:[#allocation7 + $0x70] sm:$0xff]  }
  0xad   :  { %1874 = vmatpush3.bf16.msra.mxu1 %v2143_v53  ;;  %v2156_v53 = vld [vmem:[#allocation7 + $0xa0] sm:$0xff]  }
  0xae   :  { %1140 = vmatpush1.bf16.msra.mxu0 %v2057_v5  ;;  %1875 = vmatprep.subr.bf16.mxu1 %v2144_v54  ;;  %v2263_v5 = vmov 0.0   ;;  %v2157_v54 = vld [vmem:[#allocation7 + $0xa8] sm:$0xff]  }
  0xaf   :  { %1141 = vmatprep.subr.bf16.mxu0 %v2064_v8  ;;  %v285_v8 = vld [vmem:[%s2371_s2] sm:$0x7] }
  0xb0   :  { %v298_v9 = vrot.slane %v285_v8, %v297_v7 }
  0xb1   :  { %1876 = vmatpush3.bf16.msra.mxu1 %v2145_v55  ;;  %v2158_v55 = vld [vmem:[#allocation7 + $0xb0] sm:$0xff]  }
  0xb2   :  { %1142 = vmatpush1.bf16.msra.mxu0 %v2062_v10  ;;  %1877 = vmatprep.subr.bf16.mxu1 %v2146_v56  ;;  %v2159_v56 = vld [vmem:[#allocation7 + $0xb8] sm:$0xff]  }
  0xb3   :  { %1143 = vmatprep.subr.bf16.mxu0 %v2069_v11 }
  0xb5   :  { %1878 = vmatpush3.bf16.msra.mxu1 %v2147_v57 }
  0xb6   :  { %1144 = vmatpush1.bf16.msra.mxu0 %v2067_v13  ;;  %1879 = vmatprep.subr.bf16.mxu1 %v2148_v0 }
  0xb7   :  { %1156 = vmatprep.subr.bf16.mxu0 %v2074_v14 }
  0xb9   :  { %1146 = vmatmul.mubr.bf16.vlgmr.msra.gmra.mrb[0].mxu0 %v2334_v35  ;;  %v2118_v35 = vld [vmem:[#allocation5 + $0x3f0] ss:$12 sps:$4 sm:$0xff]   ;;  %1880 = vmatpush3.bf16.msra.mxu1 %v2149_v1 }
  0xba   :  { %1157 = vmatpush1.bf16.msra.mxu0 %v2072_v15  ;;  %1188 = vmatprep.mubr.bf16.mxu0 %v92_v61 }
  0xbb   :  { %1158 = vmatprep.subr.bf16.mxu0 %v2079_v16  ;;  %1881 = vmatprep.subr.bf16.mxu1 %v2150_v2 }
  0xbd   :  { %1882 = vmatpush3.bf16.msra.mxu1 %v2151_v3 }
  0xbe   :  { %1159 = vmatpush1.bf16.msra.mxu0 %v2077_v17  ;;  %1898 = vmatprep.subr.bf16.mxu1 %v2263_v5 }
  0xbf   :  { %1160 = vmatprep.subr.bf16.mxu0 %v2084_v18 }
  0xc2   :  { %1161 = vmatpush1.bf16.msra.mxu0 %v2082_v19 }
  0xc3   :  { %1162 = vmatprep.subr.bf16.mxu0 %v2089_v20 }
  0xc6   :  { %1163 = vmatpush1.bf16.msra.mxu0 %v2087_v21 }
  0xc7   :  { %1164 = vmatprep.subr.bf16.mxu0 %v2094_v22 }
  0xca   :  { %1165 = vmatpush1.bf16.msra.mxu0 %v2092_v23 }
  0xcb   :  { %1166 = vmatprep.subr.bf16.mxu0 %v2099_v24 }
  0xce   :  { %1167 = vmatpush1.bf16.msra.mxu0 %v2097_v25 }
  0xcf   :  { %1168 = vmatprep.subr.bf16.mxu0 %v2104_v26 }
  0xd2   :  { %1169 = vmatpush1.bf16.msra.mxu0 %v2102_v27 }
  0xd3   :  { %1170 = vmatprep.subr.bf16.mxu0 %v2109_v28 }
  0xd6   :  { %1171 = vmatpush1.bf16.msra.mxu0 %v2107_v29 }
  0xd7   :  { %1172 = vmatprep.subr.bf16.mxu0 %v2114_v30 }
  0xda   :  { %1173 = vmatpush1.bf16.msra.mxu0 %v2112_v31  ;;  %v289_v31 = vsub.s32 0, %v288_v6 }
  0xdb   :  { %1174 = vmatprep.subr.bf16.mxu0 %v2117_v32  ;;  %v293_v32 = vsub.s32 1, %v288_v6 }
  0xde   :  { %1175 = vmatpush1.bf16.msra.mxu0 %v2115_v33  ;;  %v290_v33 = vrot.slane %v285_v8, %v289_v31 }
  0xdf   :  { %1176 = vmatprep.subr.bf16.mxu0 %v2120_v34  ;;  %v294_v34 = vrot.slane %v285_v8, %v293_v32 }
  0xe2   :  { %1177 = vmatpush1.bf16.msra.mxu0 %v2118_v35 }
  0xe3   :  { %1178 = vmatprep.subr.bf16.mxu0 %v2123_v36 }
  0xe6   :  { %1179 = vmatpush1.bf16.msra.mxu0 %v2121_v37 }
  0xe7   :  { %1180 = vmatprep.subr.bf16.mxu0 %v2126_v38 }
  0xea   :  { %1181 = vmatpush1.bf16.msra.mxu0 %v2124_v39 }
  0xeb   :  { %1182 = vmatprep.subr.bf16.mxu0 %v2129_v40 }
  0xee   :  { %1183 = vmatpush1.bf16.msra.mxu0 %v2127_v41 }
  0xef   :  { %1184 = vmatprep.subr.bf16.mxu0 %v2132_v42 }
  0xf2   :  { %1185 = vmatpush1.bf16.msra.mxu0 %v2130_v43 }
  0xf3   :  { %1186 = vmatprep.subr.bf16.mxu0 %v2135_v44 }
  0xf6   :  { %1187 = vmatpush1.bf16.msra.mxu0 %v2133_v45 }
  0xf9   :  { %1189 = vmatmul.mubr.bf16.vlgmr.msra.gmra.mrb[0].mxu0 %v2337_v12 }
 0x132   :  { %v1817_v58 = vpop.f32.mrb[0].mxu1 }
 0x133   :  { %v1818_v59 = vpop.f32.mrb[1].mxu1 }
 0x134   :  { %v1819_v60 = vadd.f32 %v1818_v59, %v1817_v58  ;;  %v1820_v61 = vpop.f32.mrb[2].mxu1 }
 0x135   :  { %v1821_v62 = vpop.f32.mrb[3].mxu1 }
 0x136   :  { %v1822_v63 = vadd.f32 %v1821_v62, %v1820_v61  ;;  %v1234_v10 = vadd.f32 %v1819_v60, %v298_v9 }
 0x138   :  { %v1237_v13 = vadd.f32 %v1822_v63, %v298_v9  ;;  %v1776_v63 = vld [vmem:[%s2373_s4] ss:$0 sm:$0xff] }
 0x152   :  { %v1839_v11 = vpop.f32.mrb[4].mxu1 }
 0x153   :  { %v1840_v12 = vpop.f32.mrb[5].mxu1 }
 0x154   :  { %v1841_v14 = vadd.f32 %v1840_v12, %v1839_v11  ;;  %v1842_v15 = vpop.f32.mrb[6].mxu1 }
 0x155   :  { %v1843_v16 = vpop.f32.mrb[7].mxu1 }
 0x156   :  { %v1275_v17 = vadd.f32 %v1841_v14, %v1234_v10  ;;  %v1844_v18 = vadd.f32 %v1843_v16, %v1842_v15 }
 0x158   :  { %v1278_v19 = vadd.f32 %v1844_v18, %v1237_v13 }
 0x172   :  { %v1861_v20 = vpop.f32.mrb[8].mxu1 }
 0x173   :  { %v1862_v21 = vpop.f32.mrb[9].mxu1 }
 0x174   :  { %v1863_v22 = vadd.f32 %v1862_v21, %v1861_v20  ;;  %v1864_v23 = vpop.f32.mrb[10].mxu1 }
 0x175   :  { %v1865_v24 = vpop.f32.mrb[11].mxu1 }
 0x176   :  { %v1316_v25 = vadd.f32 %v1863_v22, %v1275_v17  ;;  %v1866_v26 = vadd.f32 %v1865_v24, %v1864_v23 }
 0x178   :  { %v1324_v27 = vmax.f32 %v1316_v25, 0.0  ;;  %v1319_v28 = vadd.f32 %v1866_v26, %v1278_v19 }
 0x17a   :  { %v1327_v29 = vmax.f32 %v1319_v28, 0.0 }
 0x17c   :  { %v1330_v30 = vpack.c.bf16 %v1327_v29, %v1324_v27 }
 0x1cc   :  { %v1190_v35 = vpop.f32.mrb[0].mxu0 }
 0x1cd   :  { %v1918_v36 = vadd.f32 %v1190_v35, %v290_v33  ;;  %v1192_v37 = vpop.f32.mrb[1].mxu0 }
 0x1ce   :  { %v1919_v38 = vadd.f32 %v1192_v37, %v294_v34  ;;  %v1194_v39 = vpop.f32.mrb[2].mxu0 }
 0x1cf   :  { %v1920_v40 = vadd.f32 %v1194_v39, %v290_v33  ;;  %v1196_v41 = vpop.f32.mrb[3].mxu0  ;;  %v1322_v43 = vmax.f32 %v1918_v36, 0.0 }
 0x1d0   :  { %v1921_v42 = vadd.f32 %v1196_v41, %v294_v34  ;;  %v1323_v45 = vmax.f32 %v1919_v38, 0.0 }
 0x1d1   :  { %v1325_v44 = vmax.f32 %v1920_v40, 0.0 }
 0x1d2   :  { %v1326_v46 = vmax.f32 %v1921_v42, 0.0 }
 0x1d3   :  { %v1328_v47 = vpack.c.bf16 %v1325_v44, %v1322_v43 }
 0x1d4   :  { %v1329_v48 = vpack.c.bf16 %v1326_v46, %v1323_v45 }
 0x1d6   :  { %1562 = vmatprep.mubr.bf16.mxu1 %v1329_v48 }
 0x1d7   :  { %1563 = vmatmul.mubr.bf16.vlgmr.msra.gmra.mrb[12].mxu1 %v1328_v47 }
 0x1d8   :  { %1899 = vmatpush3.bf16.msra.mxu1 %v2152_v49  ;;  %1914 = vmatprep.mubr.msk.bf16.mxu1 %vm2264_vm0, %v2263_v5 }
 0x1d9   :  { %1900 = vmatprep.subr.bf16.mxu1 %v2263_v5 }
 0x1dc   :  { %1901 = vmatpush3.bf16.msra.mxu1 %v2153_v50 }
 0x1dd   :  { %1902 = vmatprep.subr.bf16.mxu1 %v2263_v5 }
 0x1e0   :  { %1903 = vmatpush3.bf16.msra.mxu1 %v2154_v51 }
 0x1e1   :  { %1904 = vmatprep.subr.bf16.mxu1 %v2263_v5 }
 0x1e4   :  { %1905 = vmatpush3.bf16.msra.mxu1 %v2155_v52 }
 0x1e5   :  { %1906 = vmatprep.subr.bf16.mxu1 %v2263_v5 }
 0x1e8   :  { %1907 = vmatpush3.bf16.msra.mxu1 %v2156_v53 }
 0x1e9   :  { %1908 = vmatprep.subr.bf16.mxu1 %v2263_v5 }
 0x1ec   :  { %1909 = vmatpush3.bf16.msra.mxu1 %v2157_v54 }
 0x1ed   :  { %1910 = vmatprep.subr.bf16.mxu1 %v2263_v5 }
 0x1f0   :  { %1911 = vmatpush3.bf16.msra.mxu1 %v2158_v55 }
 0x1f1   :  { %1912 = vmatprep.subr.bf16.mxu1 %v2263_v5 }
 0x1f4   :  { %1913 = vmatpush3.bf16.msra.mxu1 %v2159_v56 }
 0x1f7   :  { %1915 = vmatmul.mubr.bf16.vlgmr.msra.gmra.mrb[16].mxu1 %v1330_v30 }
 0x2aa   :  { %v1883_v57 = vpop.f32.mrb[12].mxu1 }
 0x2ab   :  { %v1884_v58 = vpop.f32.mrb[13].mxu1 }
 0x2ac   :  { %v1885_v59 = vadd.f32 %v1884_v58, %v1883_v57  ;;  %v1886_v60 = vpop.f32.mrb[14].mxu1 }
 0x2ad   :  { %v1887_v61 = vpop.f32.mrb[15].mxu1 }
 0x2ae   :  { %v1888_v62 = vadd.f32 %v1887_v61, %v1886_v60  ;;  %v1565_v0 = vadd.f32 %v1885_v59, %v1776_v63 }
 0x2b0   :  { %v1568_v4 = vadd.f32 %v1888_v62, %v1776_v63 }
 0x2ca   :  { %v1605_v1 = vpop.f32.mrb[16].mxu1 }
 0x2cb   :  { %v1606_v2 = vadd.f32 %v1605_v1, %v1565_v0  ;;  %v1916_v3 = vpop.f32.mrb[17].mxu1 }
 0x2cc   :  { %v1608_v5 = vpop.f32.mrb[18].mxu1 }
 0x2cd   :  { %1612 = vst [vmem:[#allocation8] sm:$0xff] %v1606_v2  ;;  %v1609_v6 = vadd.f32 %v1608_v5, %v1568_v4  ;;  %v1917_v7 = vpop.f32.mrb[19].mxu1 }
 0x2cf   :  { %1613 = vst [vmem:[#allocation8 + $0x8] sm:$0xff] %v1609_v6 }
 0x2d0   :  { %2237 = shalt.err (!%p2234_p0)
}
 0x2d1   :  { %s2238_s14 = scalar_lea.hbm %s2374_s5, 256 }
 0x2d2   :  { %p2239_p1 = scmp.ne.s32.totalorder %s2374_s5, %s2238_s14  ;;  %p2242_p2 = scmp.lt.u32.totalorder %s2238_s14, %s2374_s5 }
 0x2d4   :  { %p2244_p3 = pnand %p2242_p2, %p2239_p1 }
 0x2d6   :  { %2247 = shalt.err (!%p2244_p3)
}
 0x2d7   :  { %s2266_s18 = smov 128   ;;  %s2267_s19 = smov 8  }
 0x2d8   :  { %1625 = dma.vmem_to_hbm [thread:$0]  %s1620_s11, 256, %s2374_s5, [#allocation4], %s2266_s18, %s2266_s18, %s2267_s19  }
 0x2d9   :  { %2252 = dma.done.wait [#allocation4], 256  }
 0x2da   :  { %2253 = vsyncadd [#allocation4], 4294967040 }
 0x2db   :  { %1629 = vsyncpa [#allocation3], 1 }
 0x2dc   :  { %1630 = vsyncpa [#allocation6], 1 }
 0x2dd   :  { %1631 = vsyncpa [#allocation4], 1 }

</bundles_post_ra>
